<compile_context>
chip_gen: v7x
topology: tpu7x:2x2x1
jax: 0.10.0
libtpu: 0.0.40
codegen_flags: <defaults>
</compile_context>

<pallas_src>
import jax
import jax.numpy as jnp
from jax import lax
from jax.experimental import pallas as pl
from jax.experimental.pallas import tpu as pltpu


def _head_kernel(feat_ref, w1_ref, b1_ref, w2_ref, b2_ref, out_ref):
    """Fused MyEffnet head (comb_method=None, inference).

    feat_ref : (TB, HW, C) bf16  NHWC-flattened backbone features (C lane-dense)
    w1_ref   : (C, R)      bf16  reducer Linear weight with BN scale & 1/HW folded
    b1_ref   : (1, R)      f32   reducer bias with BN shift folded
    w2_ref   : (R, NC)     f32   classifier Linear weight (transposed)
    b2_ref   : (1, NC)     f32   classifier Linear bias
    out_ref  : (TB, NC)    f32   logits
    """
    # AdaptiveAvgPool2d(1) + view(B, -1): sum-pool here, the 1/HW is in w1.
    pooled = jnp.sum(feat_ref[...].astype(jnp.float32), axis=1)          # (TB, C)

    # reducer_block Linear + BatchNorm1d(eval) folded; Dropout = identity (eval).
    h = jnp.dot(pooled.astype(w1_ref.dtype), w1_ref[...],
                preferred_element_type=jnp.float32) + b1_ref[...]        # (TB, R)
    h = jnp.maximum(h, 0.0)                                              # ReLU

    # classifier Linear
    out_ref[...] = jnp.dot(h, w2_ref[...],
                           preferred_element_type=jnp.float32) + b2_ref[...]


def my_effnet_forward(feat_nchw, params, *, tb=None,
                      vmem_budget_bytes=40 * 1024 * 1024, eps=1e-5):
    """Run MyEffnet.forward(img) head on the backbone feature map (comb=None)."""
    B, C, H, W = feat_nchw.shape
    HW = H * W

    # NHWC so C sits on the lane axis; bf16 halves the dominant feature DMA.
    feat = jnp.transpose(feat_nchw, (0, 2, 3, 1)).reshape(B, HW, C)
    feat = feat.astype(jnp.bfloat16)

    # Fold BatchNorm1d (eval, running stats) and the 1/HW mean into Linear #1.
    scale = params["gamma"] * lax.rsqrt(params["rvar"] + eps)            # (1, R)
    w1f = (params["w1"] * scale / HW).astype(jnp.bfloat16)               # (C, R)
    b1f = ((params["b1"] - params["rmean"]) * scale
           + params["beta"]).astype(jnp.float32)                         # (1, R)
    w2 = params["w2"].astype(jnp.float32)
    b2 = params["b2"].astype(jnp.float32)
    R, NC = w2.shape

    # Batch tile: multiple of 8 sublanes; sized so the two double-buffered
    # feature blocks stay inside a v7x-safe VMEM budget (64 MiB physical).
    if tb is None:
        row_bytes = HW * C * feat.dtype.itemsize
        tb_budget = max(8, (vmem_budget_bytes // (2 * row_bytes)) // 8 * 8)
        tb = int(min(tb_budget, max(8, pl.cdiv(B, 8) * 8), 512))
    Bp = pl.cdiv(B, tb) * tb
    if Bp != B:
        feat = jnp.pad(feat, ((0, Bp - B), (0, 0), (0, 0)))

    grid = (Bp // tb,)
    in_specs = [
        pl.BlockSpec((tb, HW, C), lambda i: (i, 0, 0)),   # streamed per batch tile
        pl.BlockSpec((C, R), lambda i: (0, 0)),           # resident weights/biases
        pl.BlockSpec((1, R), lambda i: (0, 0)),
        pl.BlockSpec((R, NC), lambda i: (0, 0)),
        pl.BlockSpec((1, NC), lambda i: (0, 0)),
    ]
    out_spec = pl.BlockSpec((tb, NC), lambda i: (i, 0))

    # Advisory cost + explicit VMEM ceiling (double buffers + resident weights).
    flops = 2 * Bp * C * R + 2 * Bp * R * NC + Bp * HW * C
    bytes_accessed = (Bp * HW * C * 2 + C * R * 2 + R * 4
                      + R * NC * 4 + NC * 4 + Bp * NC * 4)
    vmem_need = (2 * tb * HW * C * 2
                 + 2 * (C * R * 2 + R * 4 + R * NC * 4 + NC * 4)
                 + 2 * tb * NC * 4)
    vmem_limit = int(min(max(vmem_need * 3 // 2, 16 * 1024 * 1024),
                         64 * 1024 * 1024))

    out = pl.pallas_call(
        _head_kernel,
        out_shape=jax.ShapeDtypeStruct((Bp, NC), jnp.float32),
        grid=grid,
        in_specs=in_specs,
        out_specs=out_spec,
        cost_estimate=pl.CostEstimate(flops=flops, transcendentals=0,
                                      bytes_accessed=bytes_accessed),
        compiler_params=pltpu.CompilerParams(
            dimension_semantics=("parallel",),   # v7x: shard batch tiles over 2 TCs
            vmem_limit_bytes=vmem_limit),
    )(feat, w1f, b1f, w2, b2)
    return out[:B]


def init_params(key, n_feat_conv, neurons_reducer_block, num_class):
    """Deterministic synthetic parameters matching the module's shapes."""
    k1, k2, k3, k4, k5, k6, k7, k8 = jax.random.split(key, 8)
    w1 = jax.random.normal(k1, (n_feat_conv, neurons_reducer_block),
                           jnp.float32) * 0.05
    b1 = jax.random.normal(k2, (1, neurons_reducer_block), jnp.float32) * 0.05
    gamma = 1.0 + 0.1 * jax.random.normal(k3, (1, neurons_reducer_block),
                                          jnp.float32)
    beta = 0.1 * jax.random.normal(k4, (1, neurons_reducer_block), jnp.float32)
    rmean = 0.1 * jax.random.normal(k5, (1, neurons_reducer_block), jnp.float32)
    rvar = jax.random.uniform(k6, (1, neurons_reducer_block), jnp.float32,
                              0.5, 1.5)
    w2 = jax.random.normal(k7, (neurons_reducer_block, num_class),
                           jnp.float32) * 0.05
    b2 = jax.random.normal(k8, (1, num_class), jnp.float32) * 0.05
    return dict(w1=w1, b1=b1, gamma=gamma, beta=beta,
                rmean=rmean, rvar=rvar, w2=w2, b2=b2)


def reference_forward(feat_nchw, p):
    """Pure-JAX f32 reference of the same forward pass (sanity check)."""
    x = jnp.mean(feat_nchw.astype(jnp.float32), axis=(2, 3))        # avg pool
    x = x @ p["w1"] + p["b1"]
    x = (x - p["rmean"]) * lax.rsqrt(p["rvar"] + 1e-5) * p["gamma"] + p["beta"]
    x = jnp.maximum(x, 0.0)
    return x @ p["w2"] + p["b2"]


if __name__ == "__main__":
    # Small shapes consistent with the module's head:
    #   backbone feature map (B, n_feat_conv, Hf, Wf)
    B, n_feat_conv, Hf, Wf = 4, 256, 8, 8
    neurons_reducer_block = 128
    num_class = 16

    key = jax.random.PRNGKey(0)
    k_feat, k_par = jax.random.split(key)
    feat = jax.random.normal(k_feat, (B, n_feat_conv, Hf, Wf), jnp.float32)
    params = init_params(k_par, n_feat_conv, neurons_reducer_block, num_class)

    logits = my_effnet_forward(feat, params)
    logits = jax.block_until_ready(logits)

    ref = jax.block_until_ready(reference_forward(feat, params))
    assert logits.shape == (B, num_class)
    # Feature map / w1 travel as bf16 -> compare at bf16-level tolerance.
    assert jnp.allclose(logits, ref, atol=3e-2, rtol=3e-2), "mismatch vs reference"

    print("KERNEL_OK")
</pallas_src>

<mosaic_0001>
module attributes {stable_mosaic.version = 11 : i64} {
  func.func @_head_kernel(%arg0: i32, %arg1: memref<8x64x256xbf16, #tpu.memory_space<vmem>>, %arg2: memref<256x128xbf16, #tpu.memory_space<vmem>>, %arg3: memref<1x128xf32, #tpu.memory_space<vmem>>, %arg4: memref<128x16xf32, #tpu.memory_space<vmem>>, %arg5: memref<1x16xf32, #tpu.memory_space<vmem>>, %arg6: memref<8x16xf32, #tpu.memory_space<vmem>>) attributes {dimension_semantics = [#tpu.dimension_semantics<parallel>], iteration_bounds = array<i64: 1>, scalar_prefetch = 0 : i64, scratch_operands = 0 : i64, tpu.core_type = #tpu.core_type<tc>, window_params = [{transform_indices = @transform_0, window_bounds = array<i64: 8, 64, 256>}, {pipeline_mode = #tpu.pipeline_mode<synchronous>, transform_indices = @transform_1, window_bounds = array<i64: 256, 128>}, {pipeline_mode = #tpu.pipeline_mode<synchronous>, transform_indices = @transform_2, window_bounds = array<i64: 1, 128>}, {pipeline_mode = #tpu.pipeline_mode<synchronous>, transform_indices = @transform_3, window_bounds = array<i64: 128, 16>}, {pipeline_mode = #tpu.pipeline_mode<synchronous>, transform_indices = @transform_4, window_bounds = array<i64: 1, 16>}, {transform_indices = @transform_5, window_bounds = array<i64: 8, 16>}]} {
    %c0 = arith.constant 0 : index
    %c0_0 = arith.constant 0 : index
    %c0_1 = arith.constant 0 : index
    %0 = vector.load %arg1[%c0, %c0_0, %c0_1] : memref<8x64x256xbf16, #tpu.memory_space<vmem>>, vector<8x64x256xbf16>
    %1 = arith.extf %0 : vector<8x64x256xbf16> to vector<8x64x256xf32>
    %cst = arith.constant dense<0.000000e+00> : vector<8x256xf32>
    %2 = vector.multi_reduction <add>, %1, %cst [1] : vector<8x64x256xf32> to vector<8x256xf32>
    %3 = arith.truncf %2 : vector<8x256xf32> to vector<8x256xbf16>
    %c0_2 = arith.constant 0 : index
    %c0_3 = arith.constant 0 : index
    %4 = vector.load %arg2[%c0_2, %c0_3] : memref<256x128xbf16, #tpu.memory_space<vmem>>, vector<256x128xbf16>
    %cst_4 = arith.constant dense<0.000000e+00> : vector<8x128xf32>
    %5 = tpu.matmul %3, %4, %cst_4 {dimension_numbers = #tpu.dot_dimension_numbers<[1], [0], [0], [1], [0, 0, 1, 1], [], []>} : vector<8x256xbf16>, vector<256x128xbf16>, vector<8x128xf32> -> vector<8x128xf32>
    %c0_5 = arith.constant 0 : index
    %c0_6 = arith.constant 0 : index
    %6 = vector.load %arg3[%c0_5, %c0_6] : memref<1x128xf32, #tpu.memory_space<vmem>>, vector<1x128xf32>
    %7 = vector.broadcast %6 : vector<1x128xf32> to vector<8x128xf32>
    %8 = arith.addf %5, %7 : vector<8x128xf32>
    %cst_7 = arith.constant 0.000000e+00 : f32
    %9 = vector.broadcast %cst_7 : f32 to vector<8x128xf32>
    %10 = arith.maximumf %8, %9 : vector<8x128xf32>
    %c0_8 = arith.constant 0 : index
    %c0_9 = arith.constant 0 : index
    %11 = vector.load %arg4[%c0_8, %c0_9] : memref<128x16xf32, #tpu.memory_space<vmem>>, vector<128x16xf32>
    %cst_10 = arith.constant dense<0.000000e+00> : vector<8x16xf32>
    %12 = tpu.matmul %10, %11, %cst_10 {dimension_numbers = #tpu.dot_dimension_numbers<[1], [0], [0], [1], [0, 0, 1, 1], [], []>} : vector<8x128xf32>, vector<128x16xf32>, vector<8x16xf32> -> vector<8x16xf32>
    %c0_11 = arith.constant 0 : index
    %c0_12 = arith.constant 0 : index
    %13 = vector.load %arg5[%c0_11, %c0_12] : memref<1x16xf32, #tpu.memory_space<vmem>>, vector<1x16xf32>
    %14 = vector.broadcast %13 : vector<1x16xf32> to vector<8x16xf32>
    %15 = arith.addf %12, %14 : vector<8x16xf32>
    %c0_13 = arith.constant 0 : index
    %c0_14 = arith.constant 0 : index
    %16 = vector.load %arg6[%c0_13, %c0_14] : memref<8x16xf32, #tpu.memory_space<vmem>>, vector<8x16xf32>
    tpu.vector_store %arg6[%c0_13, %c0_14], %15 {strides = array<i32>} : memref<8x16xf32, #tpu.memory_space<vmem>>, vector<8x16xf32>,
    return
  }
  func.func @transform_0(%arg0: i32) -> (i32, i32, i32) {
    %c0_i32 = arith.constant 0 : i32
    %c0_i32_0 = arith.constant 0 : i32
    %c0_i32_1 = arith.constant 0 : i32
    return %arg0, %c0_i32, %c0_i32_0 : i32, i32, i32
  }
  func.func @transform_1(%arg0: i32) -> (i32, i32) {
    %c0_i32 = arith.constant 0 : i32
    %c0_i32_0 = arith.constant 0 : i32
    %c0_i32_1 = arith.constant 0 : i32
    return %c0_i32, %c0_i32_0 : i32, i32
  }
  func.func @transform_2(%arg0: i32) -> (i32, i32) {
    %c0_i32 = arith.constant 0 : i32
    %c0_i32_0 = arith.constant 0 : i32
    %c0_i32_1 = arith.constant 0 : i32
    return %c0_i32, %c0_i32_0 : i32, i32
  }
  func.func @transform_3(%arg0: i32) -> (i32, i32) {
    %c0_i32 = arith.constant 0 : i32
    %c0_i32_0 = arith.constant 0 : i32
    %c0_i32_1 = arith.constant 0 : i32
    return %c0_i32, %c0_i32_0 : i32, i32
  }
  func.func @transform_4(%arg0: i32) -> (i32, i32) {
    %c0_i32 = arith.constant 0 : i32
    %c0_i32_0 = arith.constant 0 : i32
    %c0_i32_1 = arith.constant 0 : i32
    return %c0_i32, %c0_i32_0 : i32, i32
  }
  func.func @transform_5(%arg0: i32) -> (i32, i32) {
    %c0_i32 = arith.constant 0 : i32
    %c0_i32_0 = arith.constant 0 : i32
    return %arg0, %c0_i32 : i32, i32
  }
}

</mosaic_0001>

<bundles_post_ra>
// kernel: tpu_custom_call.1
= control target key start
LH: loop header
LB: loop body
LE: loop exit
PB: predicated region body
PF: predicated region fallthrough
CT: control target
= control target key end

     0   :  { %10 = vsyncpa [#allocation3], 0  ;;  %s1653_s0 = inlined_call_operand.hbm [shape: bf16[8,64,256], index: 0, kind: input, shape index: {}]   ;;  %s1654_s1 = inlined_call_operand.vmem [shape: bf16[256,128], index: 1, kind: input, shape index: {}]   ;;  %s1655_s2 = inlined_call_operand.vmem [shape: f32[1,128], index: 2, kind: input, shape index: {}]   ;;  %s1656_s3 = inlined_call_operand.vmem [shape: f32[128,16], index: 3, kind: input, shape index: {}]   ;;  %s1657_s4 = inlined_call_operand.vmem [shape: f32[1,16], index: 4, kind: input, shape index: {}]   ;;  %s1658_s5 = inlined_call_operand.hbm [shape: f32[8,16], index: 5, kind: output, shape index: {}]  }
   0x1   :  { %11 = vsyncpa [#allocation4], 0  ;;  %s982_s18 = smov [#allocation2]   ;;  %s934_s22 = scalar_lea.hbm %s1653_s0, 8192 }
   0x2   :  { %s17_s19 = sshll.u32 %s982_s18, 4  ;;  %p935_p0 = scmp.ne.s32.totalorder %s1653_s0, %s934_s22  ;;  %s18_s19 = int_to_ptr.vmem [resolvable:$true] %s17_s19 }
   0x3   :  { %p938_p1 = scmp.lt.u32.totalorder %s934_s22, %s1653_s0 }
   0x5   :  { %p940_p2 = pnand %p938_p1, %p935_p0 }
   0x7   :  { %943 = shalt.err (!%p940_p2)
}
   0x8   :  { %s944_s27 = scalar_lea.vmem %s18_s19, 8192  ;;  %p949_p4 = scmp.lt.s32.totalorder %s18_s19, %s18_s19 }
   0x9   :  { %p945_p3 = scmp.ne.s32.totalorder %s18_s19, %s944_s27  ;;  %p950_p5 = scmp.lt.s32.totalorder %s944_s27, %s944_s27 }
   0xb   :  { %p951_p6 = por %p950_p5, %p949_p4 }
   0xd   :  { %p952_p7 = pnand %p951_p6, %p945_p3 }
   0xf   :  { %955 = shalt.err (!%p952_p7)
}
  0x10   :  { %s983_s28 = smov 128   ;;  %s984_s29 = smov 8  }
  0x11   :  { %23 = dma.hbm_to_vmem [thread:$0]  %s1653_s0, 8192, %s18_s19, [#allocation3], %s983_s28, %s983_s28, %s984_s29  }
  0x12   :  { %978 = dma.done.wait [#allocation3], 8192  }
  0x13   :  { %979 = vsyncadd [#allocation3], 4294959104  ;;  %v1659_v0 = vmov 0.0|0.0   ;;  %v918_v1 = vld [vmem:[%s1654_s1 + $0x40] sm:$0xff]   ;;  %v920_v3 = vld [vmem:[%s1654_s1 + $0x48] sm:$0xff]   ;;  %vm523_vm0 = vcmask 1041409  }
  0x14   :  { %887 = vmatprep.subr.bf16.mxu1 %v1659_v0  ;;  %v919_v2 = vld [vmem:[%s1654_s1] sm:$0xff]   ;;  %813 = vmatprep.subr.bf16.mxu0 %v918_v1  ;;  %v921_v4 = vld [vmem:[%s1654_s1 + $0x8] sm:$0xff]   ;;  %v922_v5 = vld [vmem:[%s1654_s1 + $0x50] sm:$0xff]   ;;  %vm525_vm1 = vcmask 1042434   ;;  %vm527_vm2 = vcmask 1043459   ;;  %vm529_vm3 = vcmask 1044484  }
  0x15   :  { %814 = vmatpush3.bf16.msra.mxu0 %v919_v2  ;;  %v923_v6 = vld [vmem:[%s1654_s1 + $0x10] sm:$0xff]   ;;  %v924_v7 = vld [vmem:[%s1654_s1 + $0x58] sm:$0xff]   ;;  %v926_v9 = vld [vmem:[%s1654_s1 + $0x60] sm:$0xff]   ;;  %vm531_vm4 = vcmask 1045509   ;;  %vm533_vm5 = vcmask 1046534   ;;  %vm535_vm6 = vcmask 1047559  }
  0x16   :  { %815 = vmatprep.subr.bf16.mxu0 %v920_v3  ;;  %v925_v8 = vld [vmem:[%s1654_s1 + $0x18] sm:$0xff]   ;;  %v927_v10 = vld [vmem:[%s1654_s1 + $0x20] sm:$0xff]   ;;  %v928_v11 = vld [vmem:[%s1654_s1 + $0x68] sm:$0xff]   ;;  %vm986_vm7 = vmmov 0   ;;  %vm778_vm8 = vcmask 130048  }
  0x17   :  { %v1065_v12 = vld [vmem:[#allocation2] sm:$0xff]  ;;  %v1067_v13 = vld [vmem:[#allocation2 + $0x8] sm:$0xff]  ;;  %v1069_v14 = vld [vmem:[#allocation2 + $0x10] sm:$0xff] }
  0x18   :  { %1708 = vst [vmem:[#allocation8_spill] sm:$0xff] %v1065_v12  ;;  %1709 = vst [vmem:[#allocation9_spill] sm:$0xff] %v1067_v13  ;;  %v929_v15 = vld [vmem:[%s1654_s1 + $0x28] sm:$0xff]   ;;  %v1074_v16 = vld [vmem:[#allocation2 + $0x18] sm:$0xff] }
  0x19   :  { %816 = vmatpush3.bf16.msra.mxu0 %v921_v4  ;;  %v1076_v17 = vld [vmem:[#allocation2 + $0x20] sm:$0xff]  ;;  %v1078_v18 = vld [vmem:[#allocation2 + $0x28] sm:$0xff]  ;;  %v1084_v23 = vld [vmem:[#allocation2 + $0x30] sm:$0xff] }
  0x1a   :  { %817 = vmatprep.subr.bf16.mxu0 %v922_v5  ;;  %v1086_v24 = vld [vmem:[#allocation2 + $0x38] sm:$0xff]  ;;  %v1088_v25 = vld [vmem:[#allocation2 + $0x40] sm:$0xff]  ;;  %v1094_v30 = vld [vmem:[#allocation2 + $0x48] sm:$0xff] }
  0x1b   :  { %1710 = vst [vmem:[#allocation10_spill] sm:$0xff] %v1086_v24  ;;  %1711 = vst [vmem:[#allocation11_spill] sm:$0xff] %v1094_v30  ;;  %v1096_v31 = vld [vmem:[#allocation2 + $0x50] sm:$0xff]  ;;  %v1098_v32 = vld [vmem:[#allocation2 + $0x58] sm:$0xff] }
  0x1c   :  { %v930_v37 = vld [vmem:[%s1654_s1 + $0x70] sm:$0xff]   ;;  %v1107_v38 = vld [vmem:[#allocation2 + $0x60] sm:$0xff]  ;;  %v1109_v39 = vld [vmem:[#allocation2 + $0x68] sm:$0xff] }
  0x1d   :  { %818 = vmatpush3.bf16.msra.mxu0 %v923_v6  ;;  %v1115_v44 = vld [vmem:[#allocation2 + $0x70] sm:$0xff]  ;;  %v1117_v45 = vld [vmem:[#allocation2 + $0x78] sm:$0xff]  ;;  %v1123_v50 = vld [vmem:[#allocation2 + $0x80] sm:$0xff] }
  0x1e   :  { %819 = vmatprep.subr.bf16.mxu0 %v924_v7  ;;  %1712 = vst [vmem:[#allocation12_spill] sm:$0xff] %v1117_v45  ;;  %1713 = vst [vmem:[#allocation13_spill] sm:$0xff] %v1123_v50  ;;  %v1125_v51 = vld [vmem:[#allocation2 + $0x88] sm:$0xff]  ;;  %v931_v56 = vld [vmem:[%s1654_s1 + $0x30] sm:$0xff]  }
  0x1f   :  { %1714 = vst [vmem:[#allocation14_spill] sm:$0xff] %v1125_v51  ;;  %v1134_v57 = vld [vmem:[#allocation2 + $0x90] sm:$0xff]  ;;  %v1136_v58 = vld [vmem:[#allocation2 + $0x98] sm:$0xff]  ;;  %v1145_v1 = vld [vmem:[#allocation2 + $0xa0] sm:$0xff] }
  0x20   :  { %v932_v63 = vld [vmem:[%s1654_s1 + $0x78] sm:$0xff]   ;;  %v1147_v2 = vld [vmem:[#allocation2 + $0xa8] sm:$0xff]  ;;  %v1153_v7 = vld [vmem:[#allocation2 + $0xb0] sm:$0xff] }
  0x21   :  { %820 = vmatpush3.bf16.msra.mxu0 %v925_v8  ;;  %1715 = vst [vmem:[#allocation15_spill] sm:$0xff] %v1153_v7  ;;  %v1155_v8 = vld [vmem:[#allocation2 + $0xb8] sm:$0xff]  ;;  %v1163_v0 = vld [vmem:[#allocation2 + $0xc8] sm:$0xff]  ;;  %v1172_v35 = vld [vmem:[#allocation2 + $0xd0] sm:$0xff] }
  0x22   :  { %821 = vmatprep.subr.bf16.mxu0 %v926_v9  ;;  %1716 = vst [vmem:[#allocation16_spill] sm:$0xff] %v1155_v8  ;;  %v933_v61 = vld [vmem:[%s1654_s1 + $0x38] sm:$0xff]   ;;  %v1180_v3 = vld [vmem:[#allocation2 + $0xe0] sm:$0xff]  ;;  %v1188_v33 = vld [vmem:[#allocation2 + $0xf0] sm:$0xff] }
  0x23   :  { %v1174_v59 = vld [vmem:[#allocation2 + $0xd8] sm:$0xff]  ;;  %1718 = vst [vmem:[#allocation18_spill] sm:$0xff] %v1188_v33  ;;  %v1196_v19 = vld [vmem:[#allocation2 + $0x100] sm:$0xff]  ;;  %v1198_v52 = vld [vmem:[#allocation2 + $0x108] sm:$0xff] }
  0x24   :  { %v1190_v48 = vld [vmem:[#allocation2 + $0xf8] sm:$0xff]  ;;  %1720 = vst [vmem:[#allocation20_spill] sm:$0xff] %v1196_v19  ;;  %1721 = vst [vmem:[#allocation21_spill] sm:$0xff] %v1198_v52  ;;  %v1204_v28 = vld [vmem:[#allocation2 + $0x110] sm:$0xff] }
  0x25   :  { %822 = vmatpush3.bf16.msra.mxu0 %v927_v10  ;;  %1719 = vst [vmem:[#allocation19_spill] sm:$0xff] %v1190_v48  ;;  %v1206_v26 = vld [vmem:[#allocation2 + $0x118] sm:$0xff]  ;;  %v1214_v62 = vld [vmem:[#allocation2 + $0x128] sm:$0xff]  ;;  %v1220_v60 = vld [vmem:[#allocation2 + $0x130] sm:$0xff] }
  0x26   :  { %823 = vmatprep.subr.bf16.mxu0 %v928_v11  ;;  %v1212_v11 = vld [vmem:[#allocation2 + $0x120] sm:$0xff]  ;;  %1722 = vst [vmem:[#allocation22_spill] sm:$0xff] %v1220_v60  ;;  %v1222_v46 = vld [vmem:[#allocation2 + $0x138] sm:$0xff]  ;;  %v1230_v6 = vld [vmem:[#allocation2 + $0x148] sm:$0xff] }
  0x27   :  { %1723 = vst [vmem:[#allocation23_spill] sm:$0xff] %v1222_v46  ;;  %v1228_v43 = vld [vmem:[#allocation2 + $0x140] sm:$0xff]  ;;  %1724 = vst [vmem:[#allocation24_spill] sm:$0xff] %v1230_v6  ;;  %v1236_v55 = vld [vmem:[#allocation2 + $0x150] sm:$0xff] }
  0x28   :  { %v1238_v41 = vld [vmem:[#allocation2 + $0x158] sm:$0xff]  ;;  %v1244_v53 = vld [vmem:[#allocation2 + $0x160] sm:$0xff]  ;;  %v1246_v36 = vld [vmem:[#allocation2 + $0x168] sm:$0xff] }
  0x29   :  { %824 = vmatpush3.bf16.msra.mxu0 %v929_v15  ;;  %v1252_v34 = vld [vmem:[#allocation2 + $0x170] sm:$0xff]  ;;  %v1254_v4 = vld [vmem:[#allocation2 + $0x178] sm:$0xff]  ;;  %v1260_v21 = vld [vmem:[#allocation2 + $0x180] sm:$0xff] }
  0x2a   :  { %825 = vmatprep.subr.bf16.mxu0 %v930_v37  ;;  %v1161_v37 = vld [vmem:[#allocation2 + $0xc0] sm:$0xff]  ;;  %1725 = vst [vmem:[#allocation25_spill] sm:$0xff] %v1252_v34  ;;  %1726 = vst [vmem:[#allocation26_spill] sm:$0xff] %v1254_v4  ;;  %v1268_v15 = vld [vmem:[#allocation2 + $0x190] sm:$0xff]  ;;  %v197_v10 = vunpack.c.h.bf16 %v1260_v21 }
  0x2b   :  { %1717 = vst [vmem:[#allocation17_spill] sm:$0xff] %v1161_v37  ;;  %1727 = vst [vmem:[#allocation27_spill] sm:$0xff] %v1260_v21  ;;  %v1270_v9 = vld [vmem:[#allocation2 + $0x198] sm:$0xff]  ;;  %v1276_v49 = vld [vmem:[#allocation2 + $0x1a0] sm:$0xff]  ;;  %v201_v47 = vunpack.c.h.bf16 %v1268_v15 }
  0x2c   :  { %1729 = vst [vmem:[#allocation29_spill] sm:$0xff] %v1268_v15  ;;  %1730 = vst [vmem:[#allocation30_spill] sm:$0xff] %v1270_v9  ;;  %v1278_v54 = vld [vmem:[#allocation2 + $0x1a8] sm:$0xff]  ;;  %v1284_v22 = vld [vmem:[#allocation2 + $0x1b0] sm:$0xff]  ;;  %v203_v4 = vunpack.c.h.bf16 %v1270_v9  ;;  %v1743_v15 = vunpack.c.h.bf16 %v1065_v12  ;;  %v1751_v12 = vunpack.c.h.bf16 %v1196_v19  ;;  %v1758_v19 = vunpack.c.h.bf16 %v1172_v35 }
  0x2d   :  { %826 = vmatpush3.bf16.msra.mxu0 %v931_v56  ;;  %v1182_v56 = vld [vmem:[#allocation2 + $0xe8] sm:$0xff]  ;;  %1731 = vst [vmem:[#allocation31_spill] sm:$0xff] %v1276_v49  ;;  %1732 = vst [vmem:[#allocation32_spill] sm:$0xff] %v1278_v54  ;;  %v1286_v29 = vld [vmem:[#allocation2 + $0x1b8] sm:$0xff] }
  0x2e   :  { %827 = vmatprep.subr.bf16.mxu0 %v932_v63  ;;  %1733 = vst [vmem:[#allocation33_spill] sm:$0xff] %v1284_v22  ;;  %1734 = vst [vmem:[#allocation34_spill] sm:$0xff] %v1286_v29  ;;  %v1292_v46 = vld [vmem:[#allocation2 + $0x1c0] sm:$0xff]  ;;  %v1294_v40 = vld [vmem:[#allocation2 + $0x1c8] sm:$0xff]  ;;  %v1745_v29 = vunpack.c.h.bf16 %v1088_v25  ;;  %v1750_v63 = vunpack.c.h.bf16 %v1163_v0 }
  0x2f   :  { %1735 = vst [vmem:[#allocation35_spill] sm:$0xff] %v1292_v46  ;;  %1736 = vst [vmem:[#allocation36_spill] sm:$0xff] %v1294_v40  ;;  %v1300_v48 = vld [vmem:[#allocation2 + $0x1d0] sm:$0xff]  ;;  %v1302_v42 = vld [vmem:[#allocation2 + $0x1d8] sm:$0xff]  ;;  %v213_v8 = vunpack.c.h.bf16 %v1292_v46  ;;  %v215_v60 = vunpack.c.h.bf16 %v1294_v40 }
  0x30   :  { %1737 = vst [vmem:[#allocation37_spill] sm:$0xff] %v1300_v48  ;;  %1738 = vst [vmem:[#allocation38_spill] sm:$0xff] %v1302_v42  ;;  %v1308_v45 = vld [vmem:[#allocation2 + $0x1e0] sm:$0xff]  ;;  %v1310_v27 = vld [vmem:[#allocation2 + $0x1e8] sm:$0xff]  ;;  %v217_v9 = vunpack.c.h.bf16 %v1300_v48  ;;  %v219_v24 = vunpack.c.h.bf16 %v1302_v42  ;;  %v1744_v42 = vunpack.c.h.bf16 %v1067_v13  ;;  %v1752_v13 = vunpack.c.h.bf16 %v1198_v52 }
  0x31   :  { %828 = vmatpush3.bf16.msra.mxu0 %v933_v61  ;;  %v1262_v61 = vld [vmem:[#allocation2 + $0x188] sm:$0xff]  ;;  %1739 = vst [vmem:[#allocation39_spill] sm:$0xff] %v1308_v45  ;;  %1740 = vst [vmem:[#allocation40_spill] sm:$0xff] %v1310_v27  ;;  %v1316_v34 = vld [vmem:[#allocation2 + $0x1f0] sm:$0xff]  ;;  %v221_v22 = vunpack.c.h.bf16 %v1308_v45  ;;  %v223_v46 = vunpack.c.h.bf16 %v1310_v27  ;;  %v1746_v45 = vunpack.c.h.bf16 %v1094_v30  ;;  %v1747_v27 = vunpack.c.h.bf16 %v1123_v50 }
  0x32   :  { %1728 = vst [vmem:[#allocation28_spill] sm:$0xff] %v1262_v61  ;;  %v199_v20 = vunpack.c.h.bf16 %v1262_v61  ;;  %v205_v61 = vunpack.c.h.bf16 %v1276_v49  ;;  %1741 = vst [vmem:[#allocation41_spill] sm:$0xff] %v1316_v34  ;;  %v1318_v5 = vld [vmem:[#allocation2 + $0x1f8] sm:$0xff]  ;;  %v225_v40 = vunpack.c.h.bf16 %v1316_v34  ;;  %v241_v33 = vadd.f32 %v1744_v42, %v1743_v15 }
  0x33   :  { %1742 = vst [vmem:[#allocation42_spill] sm:$0xff] %v1318_v5  ;;  %v227_v48 = vunpack.c.h.bf16 %v1318_v5  ;;  %v267_v21 = vadd.f32 %v1746_v45, %v1745_v29  ;;  %v1748_v49 = vunpack.c.h.bf16 %v1125_v51  ;;  %v1749_v34 = vunpack.c.h.bf16 %v1161_v37 }
  0x34   :  { %v345_v42 = vadd.f32 %v1752_v13, %v1751_v12  ;;  %v1753_v15 = vunpack.c.h.bf16 %v1228_v43  ;;  %v1754_v30 = vunpack.c.h.bf16 %v1230_v6  ;;  %v397_v45 = vadd.f32 %v199_v20, %v197_v10 }
  0x35   :  { %v293_v7 = vadd.f32 %v1748_v49, %v1747_v27  ;;  %v319_v5 = vadd.f32 %v1750_v63, %v1749_v34  ;;  %v423_v50 = vadd.f32 %v215_v60, %v213_v8  ;;  %v1755_v51 = vunpack.c.h.bf16 %v1069_v14 }
  0x36   :  { %v371_v29 = vadd.f32 %v1754_v30, %v1753_v15  ;;  %v1756_v49 = vunpack.c.h.bf16 %v1096_v31  ;;  %v1757_v34 = vunpack.c.h.bf16 %v1134_v57  ;;  %v1759_v12 = vunpack.c.h.bf16 %v1204_v28 }
  0x37   :  { %v242_v27 = vadd.f32 %v241_v33, %v1755_v51  ;;  %v320_v52 = vadd.f32 %v319_v5, %v1758_v19  ;;  %v1760_v6 = vunpack.c.h.bf16 %v1236_v55  ;;  %v398_v20 = vadd.f32 %v397_v45, %v201_v47 }
  0x38   :  { %v268_v37 = vadd.f32 %v267_v21, %v1756_v49  ;;  %v294_v63 = vadd.f32 %v293_v7, %v1757_v34  ;;  %v346_v13 = vadd.f32 %v345_v42, %v1759_v12  ;;  %v424_v60 = vadd.f32 %v423_v50, %v217_v9 }
  0x39   :  { %v372_v30 = vadd.f32 %v371_v29, %v1760_v6  ;;  %v1761_v8 = vunpack.c.h.bf16 %v1074_v16  ;;  %v1762_v51 = vunpack.c.h.bf16 %v1098_v32  ;;  %v1763_v10 = vunpack.c.h.bf16 %v1136_v58 }
  0x3a   :  { %v1764_v15 = vunpack.c.h.bf16 %v1174_v59  ;;  %v1765_v5 = vunpack.c.h.bf16 %v1206_v26  ;;  %v1766_v49 = vunpack.c.h.bf16 %v1238_v41  ;;  %v399_v47 = vadd.f32 %v398_v20, %v203_v4 }
  0x3b   :  { %v243_v33 = vadd.f32 %v242_v27, %v1761_v8  ;;  %v269_v21 = vadd.f32 %v268_v37, %v1762_v51  ;;  %v295_v7 = vadd.f32 %v294_v63, %v1763_v10  ;;  %v425_v50 = vadd.f32 %v424_v60, %v219_v24 }
  0x3c   :  { %v321_v19 = vadd.f32 %v320_v52, %v1764_v15  ;;  %v347_v42 = vadd.f32 %v346_v13, %v1765_v5  ;;  %v373_v6 = vadd.f32 %v372_v30, %v1766_v49  ;;  %v1767_v9 = vunpack.c.h.bf16 %v1076_v17 }
  0x3d   :  { %v1768_v45 = vunpack.c.h.bf16 %v1107_v38  ;;  %v1769_v27 = vunpack.c.h.bf16 %v1145_v1  ;;  %v1770_v63 = vunpack.c.h.bf16 %v1180_v3  ;;  %v1771_v12 = vunpack.c.h.bf16 %v1212_v11 }
  0x3e   :  { %v244_v29 = vadd.f32 %v243_v33, %v1767_v9  ;;  %v1772_v8 = vunpack.c.h.bf16 %v1244_v53  ;;  %v400_v4 = vadd.f32 %v399_v47, %v205_v61  ;;  %v426_v24 = vadd.f32 %v425_v50, %v221_v22 }
  0x3f   :  { %v270_v37 = vadd.f32 %v269_v21, %v1768_v45  ;;  %v296_v34 = vadd.f32 %v295_v7, %v1769_v27  ;;  %v322_v52 = vadd.f32 %v321_v19, %v1770_v63  ;;  %v348_v13 = vadd.f32 %v347_v42, %v1771_v12  ;;  %v1782_v45 = vld [vmem:[#allocation15_spill] sm:$0xff]  ;;  %v1786_v12 = vld [vmem:[#allocation22_spill] sm:$0xff] }
  0x40   :  { %v374_v30 = vadd.f32 %v373_v6, %v1772_v8  ;;  %v1773_v20 = vunpack.c.h.bf16 %v1078_v18  ;;  %v1774_v33 = vunpack.c.h.bf16 %v1109_v39  ;;  %v1775_v21 = vunpack.c.h.bf16 %v1147_v2 }
  0x41   :  { %v1776_v7 = vunpack.c.h.bf16 %v1182_v56  ;;  %v1777_v19 = vunpack.c.h.bf16 %v1214_v62  ;;  %v1778_v42 = vunpack.c.h.bf16 %v1246_v36  ;;  %v1779_v22 = vunpack.c.h.bf16 %v1278_v54 }
  0x42   :  { %v245_v60 = vadd.f32 %v244_v29, %v1773_v20  ;;  %v271_v51 = vadd.f32 %v270_v37, %v1774_v33  ;;  %v297_v10 = vadd.f32 %v296_v34, %v1775_v21  ;;  %v427_v6 = vadd.f32 %v426_v24, %v223_v46  ;;  %v1784_v34 = vld [vmem:[#allocation18_spill] sm:$0xff] }
  0x43   :  { %v323_v15 = vadd.f32 %v322_v52, %v1776_v7  ;;  %v349_v5 = vadd.f32 %v348_v13, %v1777_v19  ;;  %v375_v49 = vadd.f32 %v374_v30, %v1778_v42  ;;  %v401_v61 = vadd.f32 %v400_v4, %v1779_v22  ;;  %v1788_v30 = vld [vmem:[#allocation25_spill] sm:$0xff] }
  0x44   :  { %v1780_v47 = vunpack.c.h.bf16 %v1084_v23  ;;  %v1781_v9 = vunpack.c.h.bf16 %v1115_v44  ;;  %v1783_v37 = vunpack.c.h.bf16 %v1782_v45  ;;  %v1785_v63 = vunpack.c.h.bf16 %v1784_v34  ;;  %v1790_v4 = vld [vmem:[#allocation33_spill] sm:$0xff] }
  0x45   :  { %v1787_v13 = vunpack.c.h.bf16 %v1786_v12  ;;  %v1789_v20 = vunpack.c.h.bf16 %v1788_v30  ;;  %v1791_v46 = vunpack.c.h.bf16 %v1790_v4  ;;  %v428_v21 = vadd.f32 %v427_v6, %v225_v40 }
  0x46   :  { %v246_v50 = vadd.f32 %v245_v60, %v1780_v47  ;;  %v272_v29 = vadd.f32 %v271_v51, %v1781_v9  ;;  %v298_v27 = vadd.f32 %v297_v10, %v1783_v37  ;;  %v324_v52 = vadd.f32 %v323_v15, %v1785_v63  ;;  %v1792_v60 = vld [vmem:[#allocation10_spill] sm:$0xff]  ;;  %v1794_v51 = vld [vmem:[#allocation12_spill] sm:$0xff]  ;;  %v1798_v15 = vld [vmem:[#allocation19_spill] sm:$0xff] }
  0x47   :  { %v350_v8 = vadd.f32 %v349_v5, %v1787_v13  ;;  %v376_v33 = vadd.f32 %v375_v49, %v1789_v20  ;;  %v402_v24 = vadd.f32 %v401_v61, %v1791_v46  ;;  %v1793_v7 = vunpack.c.h.bf16 %v1792_v60  ;;  %v1796_v10 = vld [vmem:[#allocation16_spill] sm:$0xff]  ;;  %v1800_v5 = vld [vmem:[#allocation23_spill] sm:$0xff]  ;;  %v1802_v49 = vld [vmem:[#allocation26_spill] sm:$0xff] }
  0x48   :  { %v1795_v42 = vunpack.c.h.bf16 %v1794_v51  ;;  %v1797_v47 = vunpack.c.h.bf16 %v1796_v10  ;;  %v1799_v37 = vunpack.c.h.bf16 %v1798_v15  ;;  %v1801_v13 = vunpack.c.h.bf16 %v1800_v5  ;;  %v1804_v61 = vld [vmem:[#allocation34_spill] sm:$0xff] }
  0x49   :  { %v247_v19 = vadd.f32 %v246_v50, %v1793_v7  ;;  %v1803_v20 = vunpack.c.h.bf16 %v1802_v49  ;;  %v1805_v40 = vunpack.c.h.bf16 %v1804_v61  ;;  %v429_v46 = vadd.f32 %v428_v21, %v227_v48 }
  0x4a   :  { %v273_v22 = vadd.f32 %v272_v29, %v1795_v42  ;;  %v299_v9 = vadd.f32 %v298_v27, %v1797_v47  ;;  %v325_v63 = vadd.f32 %v324_v52, %v1799_v37  ;;  %v351_v54 = vadd.f32 %v350_v8, %v1801_v13 }
  0x4b   :  { %v377_v4 = vadd.f32 %v376_v33, %v1803_v20  ;;  %v403_v6 = vadd.f32 %v402_v24, %v1805_v40  ;;  %v248_v50 = vrot.slane %v247_v19, 4  ;;  %v430_v47 = vrot.slane %v429_v46, 4 }
  0x4c   :  { %v274_v7 = vrot.slane %v273_v22, 4  ;;  %v300_v51 = vrot.slane %v299_v9, 4  ;;  %v326_v29 = vrot.slane %v325_v63, 4  ;;  %v352_v42 = vrot.slane %v351_v54, 4 }
  0x4d   :  { %v378_v10 = vrot.slane %v377_v4, 4  ;;  %v404_v27 = vrot.slane %v403_v6, 4  ;;  %v249_v15 = vadd.f32 %v248_v50, %v247_v19  ;;  %v431_v33 = vadd.f32 %v430_v47, %v429_v46 }
  0x4e   :  { %v275_v52 = vadd.f32 %v274_v7, %v273_v22  ;;  %v301_v37 = vadd.f32 %v300_v51, %v299_v9  ;;  %v327_v5 = vadd.f32 %v326_v29, %v325_v63  ;;  %v353_v8 = vadd.f32 %v352_v42, %v351_v54 }
  0x4f   :  { %v379_v13 = vadd.f32 %v378_v10, %v377_v4  ;;  %v405_v49 = vadd.f32 %v404_v27, %v403_v6  ;;  %v250_v20 = vrot.slane %v249_v15, 2  ;;  %v432_v30 = vrot.slane %v431_v33, 2 }
  0x50   :  { %v276_v61 = vrot.slane %v275_v52, 2  ;;  %v302_v24 = vrot.slane %v301_v37, 2  ;;  %v328_v48 = vrot.slane %v327_v5, 2  ;;  %v354_v21 = vrot.slane %v353_v8, 2 }
  0x51   :  { %v380_v40 = vrot.slane %v379_v13, 2  ;;  %v406_v60 = vrot.slane %v405_v49, 2  ;;  %v251_v12 = vadd.f32 %v250_v20, %v249_v15  ;;  %v433_v4 = vadd.f32 %v432_v30, %v431_v33 }
  0x52   :  { %v277_v34 = vadd.f32 %v276_v61, %v275_v52  ;;  %v303_v45 = vadd.f32 %v302_v24, %v301_v37  ;;  %v329_v19 = vadd.f32 %v328_v48, %v327_v5  ;;  %v355_v51 = vadd.f32 %v354_v21, %v353_v8 }
  0x53   :  { %v381_v22 = vadd.f32 %v380_v40, %v379_v13  ;;  %v407_v54 = vadd.f32 %v406_v60, %v405_v49  ;;  %v252_v10 = vrot.slane %v251_v12, 1  ;;  %v434_v29 = vrot.slane %v433_v4, 1 }
  0x54   :  { %v278_v9 = vrot.slane %v277_v34, 1  ;;  %v304_v63 = vrot.slane %v303_v45, 1  ;;  %v330_v6 = vrot.slane %v329_v19, 1  ;;  %v356_v46 = vrot.slane %v355_v51, 1 }
  0x55   :  { %v382_v50 = vrot.slane %v381_v22, 1  ;;  %v408_v7 = vrot.slane %v407_v54, 1  ;;  %v253_v15 = vadd.f32 %v252_v10, %v251_v12  ;;  %v435_v30 = vadd.f32 %v434_v29, %v433_v4  ;;  %v1808_v10 = vld [vmem:[#allocation9_spill] sm:$0xff] }
  0x56   :  { %v279_v61 = vadd.f32 %v278_v9, %v277_v34  ;;  %v305_v42 = vadd.f32 %v304_v63, %v303_v45  ;;  %v331_v5 = vadd.f32 %v330_v6, %v329_v19  ;;  %v357_v27 = vadd.f32 %v356_v46, %v355_v51  ;;  %v1811_v46 = vld [vmem:[#allocation11_spill] sm:$0xff]  ;;  %v1813_v29 = vld [vmem:[#allocation13_spill] sm:$0xff] }
  0x57   :  { %v383_v47 = vadd.f32 %v382_v50, %v381_v22  ;;  %v409_v60 = vadd.f32 %v408_v7, %v407_v54  ;;  %v437_v49 = vpack.c.bf16 %v253_v15, %v253_v15  ;;  %v451_v24 = vpack.c.bf16 %v435_v30, %v435_v30  ;;  %v1806_v54 = vld [vmem:[#allocation8_spill] sm:$0xff] }
  0x58   :  { %v439_v52 = vpack.c.bf16 %v279_v61, %v279_v61  ;;  %v441_v37 = vpack.c.bf16 %v305_v42, %v305_v42  ;;  %v443_v8 = vpack.c.bf16 %v331_v5, %v331_v5  ;;  %v445_v13 = vpack.c.bf16 %v357_v27, %v357_v27  ;;  %v1815_v61 = vld [vmem:[#allocation14_spill] sm:$0xff] }
  0x59   :  { %v447_v33 = vpack.c.bf16 %v383_v47, %v383_v47  ;;  %v449_v20 = vpack.c.bf16 %v409_v60, %v409_v60  ;;  %v508_v48 = vunpack.c.l.b16 %v437_v49  ;;  %v522_v51 = vunpack.c.l.b16 %v451_v24  ;;  %v1817_v47 = vld [vmem:[#allocation17_spill] sm:$0xff] }
  0x5a   :  { %v510_v21 = vunpack.c.l.b16 %v439_v52  ;;  %v512_v12 = vunpack.c.l.b16 %v441_v37  ;;  %v514_v34 = vunpack.c.l.b16 %v443_v8  ;;  %v516_v45 = vunpack.c.l.b16 %v445_v13  ;;  %v1820_v52 = vld [vmem:[#allocation20_spill] sm:$0xff]  ;;  %v1822_v8 = vld [vmem:[#allocation21_spill] sm:$0xff] }
  0x5b   :  { %v518_v40 = vunpack.c.l.b16 %v447_v33  ;;  %v520_v19 = vunpack.c.l.b16 %v449_v20  ;;  %v1807_v4 = vunpack.c.l.bf16 %v1806_v54  ;;  %v1809_v9 = vunpack.c.l.bf16 %v1808_v10  ;;  %v1825_v20 = vld [vmem:[#allocation24_spill] sm:$0xff] }
  0x5c   :  { %v537_v22 = vsel %vm523_vm0, %v510_v21, %v508_v48  ;;  %v1810_v6 = vunpack.c.l.bf16 %v1088_v25  ;;  %v1812_v50 = vunpack.c.l.bf16 %v1811_v46  ;;  %v1814_v15 = vunpack.c.l.bf16 %v1813_v29 }
  0x5d   :  { %v228_v63 = vadd.f32 %v1809_v9, %v1807_v4  ;;  %v1816_v42 = vunpack.c.l.bf16 %v1815_v61  ;;  %v538_v27 = vsel %vm525_vm1, %v512_v12, %v537_v22  ;;  %v1818_v60 = vunpack.c.l.bf16 %v1817_v47 }
  0x5e   :  { %v254_v7 = vadd.f32 %v1812_v50, %v1810_v6  ;;  %v1819_v30 = vunpack.c.l.bf16 %v1163_v0  ;;  %v1821_v37 = vunpack.c.l.bf16 %v1820_v52  ;;  %v1823_v13 = vunpack.c.l.bf16 %v1822_v8 }
  0x5f   :  { %v280_v5 = vadd.f32 %v1816_v42, %v1814_v15  ;;  %v1824_v33 = vunpack.c.l.bf16 %v1228_v43  ;;  %v1826_v24 = vunpack.c.l.bf16 %v1825_v20  ;;  %v539_v21 = vsel %vm527_vm2, %v514_v34, %v538_v27  ;;  %v1850_v20 = vld [vmem:[#allocation28_spill] sm:$0xff] }
  0x60   :  { %v306_v49 = vadd.f32 %v1819_v30, %v1818_v60  ;;  %v332_v25 = vadd.f32 %v1823_v13, %v1821_v37  ;;  %v1827_v54 = vunpack.c.l.bf16 %v1069_v14  ;;  %v1828_v22 = vunpack.c.l.bf16 %v1096_v31 }
  0x61   :  { %v358_v48 = vadd.f32 %v1826_v24, %v1824_v33  ;;  %v1829_v0 = vunpack.c.l.bf16 %v1134_v57  ;;  %v540_v9 = vsel %vm529_vm3, %v516_v45, %v539_v21  ;;  %v1830_v6 = vunpack.c.l.bf16 %v1172_v35 }
  0x62   :  { %v229_v12 = vadd.f32 %v228_v63, %v1827_v54  ;;  %v255_v4 = vadd.f32 %v254_v7, %v1828_v22  ;;  %v1831_v43 = vunpack.c.l.bf16 %v1204_v28  ;;  %v1832_v29 = vunpack.c.l.bf16 %v1236_v55  ;;  %v1857_v22 = vld [vmem:[#allocation36_spill] sm:$0xff] }
  0x63   :  { %v281_v10 = vadd.f32 %v280_v5, %v1829_v0  ;;  %v307_v46 = vadd.f32 %v306_v49, %v1830_v6  ;;  %v541_v14 = vsel %vm531_vm4, %v518_v40, %v540_v9  ;;  %v1833_v63 = vunpack.c.l.bf16 %v1074_v16 }
  0x64   :  { %v333_v50 = vadd.f32 %v332_v25, %v1831_v43  ;;  %v359_v34 = vadd.f32 %v358_v48, %v1832_v29  ;;  %v1834_v7 = vunpack.c.l.bf16 %v1098_v32  ;;  %v1835_v15 = vunpack.c.l.bf16 %v1136_v58  ;;  %v1848_v25 = vld [vmem:[#allocation27_spill] sm:$0xff] }
  0x65   :  { %v230_v31 = vadd.f32 %v229_v12, %v1833_v63  ;;  %v542_v35 = vsel %vm533_vm5, %v520_v19, %v541_v14  ;;  %v1836_v61 = vunpack.c.l.bf16 %v1174_v59  ;;  %v1837_v42 = vunpack.c.l.bf16 %v1206_v26  ;;  %v1867_v63 = vld [vmem:[#allocation22_spill] sm:$0xff] }
  0x66   :  { %v256_v57 = vadd.f32 %v255_v4, %v1834_v7  ;;  %v282_v45 = vadd.f32 %v281_v10, %v1835_v15  ;;  %v1838_v5 = vunpack.c.l.bf16 %v1238_v41  ;;  %v543_v16 = vsel %vm535_vm6, %v522_v51, %v542_v35 }
  0x67   :  { %v308_v28 = vadd.f32 %v307_v46, %v1836_v61  ;;  %v334_v55 = vadd.f32 %v333_v50, %v1837_v42  ;;  %v1839_v27 = vunpack.c.l.bf16 %v1076_v17  ;;  %v1840_v47 = vunpack.c.l.bf16 %v1107_v38  ;;  %v1861_v46 = vld [vmem:[#allocation15_spill] sm:$0xff]  ;;  %v1863_v50 = vld [vmem:[#allocation29_spill] sm:$0xff] }
  0x68   :  { %v360_v40 = vadd.f32 %v359_v34, %v1838_v5  ;;  %v1841_v60 = vunpack.c.l.bf16 %v1145_v1  ;;  %v545_v30 = vpack.c.b16 %v543_v16, %v543_v16  ;;  %v1842_v59 = vunpack.c.l.bf16 %v1180_v3  ;;  %v1865_v34 = vld [vmem:[#allocation18_spill] sm:$0xff]  ;;  %v1877_v16 = vld [vmem:[#allocation16_spill] sm:$0xff] }
  0x69   :  { %v231_v32 = vadd.f32 %v230_v31, %v1839_v27  ;;  %v257_v58 = vadd.f32 %v256_v57, %v1840_v47  ;;  %v1843_v26 = vunpack.c.l.bf16 %v1212_v11  ;;  %v1844_v41 = vunpack.c.l.bf16 %v1244_v53  ;;  %v1869_v57 = vld [vmem:[#allocation25_spill] sm:$0xff]  ;;  %v1879_v47 = vld [vmem:[#allocation30_spill] sm:$0xff] }
  0x6a   :  { %v283_v19 = vadd.f32 %v282_v45, %v1841_v60  ;;  %v309_v49 = vadd.f32 %v308_v28, %v1842_v59  ;;  %v1845_v51 = vunpack.c.l.bf16 %v1078_v18  ;;  %v1846_v8 = vunpack.c.l.bf16 %v1109_v39  ;;  %676 = vmatprep.mubr.bf16.mxu0 %v545_v30  ;;  %v1855_v39 = vld [vmem:[#allocation35_spill] sm:$0xff] }
  0x6b   :  { %v335_v52 = vadd.f32 %v334_v55, %v1843_v26  ;;  %v361_v37 = vadd.f32 %v360_v40, %v1844_v41  ;;  %v1847_v13 = vunpack.c.l.bf16 %v1147_v2  ;;  %v1849_v33 = vunpack.c.l.bf16 %v1848_v25  ;;  %v1875_v55 = vld [vmem:[#allocation12_spill] sm:$0xff]  ;;  %v1885_v41 = vld [vmem:[#allocation26_spill] sm:$0xff] }
  0x6c   :  { %v232_v17 = vadd.f32 %v231_v32, %v1845_v51  ;;  %v258_v38 = vadd.f32 %v257_v58, %v1846_v8  ;;  %v1851_v3 = vunpack.c.l.bf16 %v1850_v20  ;;  %v1852_v11 = vunpack.c.l.bf16 %v1182_v56 }
  0x6d   :  { %v284_v1 = vadd.f32 %v283_v19, %v1847_v13  ;;  %v1853_v53 = vunpack.c.l.bf16 %v1214_v62  ;;  %v1854_v18 = vunpack.c.l.bf16 %v1246_v36  ;;  %v1856_v12 = vunpack.c.l.bf16 %v1855_v39  ;;  %v1881_v19 = vld [vmem:[#allocation19_spill] sm:$0xff] }
  0x6e   :  { %v384_v24 = vadd.f32 %v1851_v3, %v1849_v33  ;;  %v310_v48 = vadd.f32 %v309_v49, %v1852_v11  ;;  %v1858_v2 = vunpack.c.l.bf16 %v1857_v22  ;;  %v1859_v0 = vunpack.c.l.bf16 %v1084_v23  ;;  %v1871_v23 = vld [vmem:[#allocation37_spill] sm:$0xff]  ;;  %v1883_v49 = vld [vmem:[#allocation23_spill] sm:$0xff]  ;;  %v1893_v22 = vld [vmem:[#allocation32_spill] sm:$0xff] }
  0x6f   :  { %v336_v21 = vadd.f32 %v335_v52, %v1853_v53  ;;  %v362_v54 = vadd.f32 %v361_v37, %v1854_v18  ;;  %v1860_v9 = vunpack.c.l.bf16 %v1115_v44  ;;  %v1862_v56 = vunpack.c.l.bf16 %v1861_v46  ;;  %v1873_v44 = vld [vmem:[#allocation10_spill] sm:$0xff]  ;;  %v1889_v33 = vld [vmem:[#allocation31_spill] sm:$0xff] }
  0x70   :  { %v410_v4 = vadd.f32 %v1858_v2, %v1856_v12  ;;  %v233_v10 = vadd.f32 %v232_v17, %v1859_v0  ;;  %v1864_v62 = vunpack.c.l.bf16 %v1863_v50  ;;  %v1866_v36 = vunpack.c.l.bf16 %v1865_v34  ;;  %v1887_v17 = vld [vmem:[#allocation38_spill] sm:$0xff]  ;;  %v1891_v53 = vld [vmem:[#allocation39_spill] sm:$0xff] }
  0x71   :  { %v259_v6 = vadd.f32 %v258_v38, %v1860_v9  ;;  %v285_v43 = vadd.f32 %v284_v1, %v1862_v56  ;;  %v1868_v31 = vunpack.c.l.bf16 %v1867_v63  ;;  %v1870_v15 = vunpack.c.l.bf16 %v1869_v57 }
  0x72   :  { %v385_v29 = vadd.f32 %v384_v24, %v1864_v62  ;;  %v311_v14 = vadd.f32 %v310_v48, %v1866_v36  ;;  %v1872_v35 = vunpack.c.l.bf16 %v1871_v23  ;;  %v1874_v28 = vunpack.c.l.bf16 %v1873_v44 }
  0x73   :  { %v337_v7 = vadd.f32 %v336_v21, %v1868_v31  ;;  %v363_v45 = vadd.f32 %v362_v54, %v1870_v15  ;;  %v1876_v5 = vunpack.c.l.bf16 %v1875_v55  ;;  %v1878_v27 = vunpack.c.l.bf16 %v1877_v16 }
  0x74   :  { %v411_v61 = vadd.f32 %v410_v4, %v1872_v35  ;;  %v234_v42 = vadd.f32 %v233_v10, %v1874_v28  ;;  %v1880_v58 = vunpack.c.l.bf16 %v1879_v47  ;;  %v1882_v30 = vunpack.c.l.bf16 %v1881_v19 }
  0x75   :  { %v260_v40 = vadd.f32 %v259_v6, %v1876_v5  ;;  %v286_v32 = vadd.f32 %v285_v43, %v1878_v27  ;;  %v1884_v26 = vunpack.c.l.bf16 %v1883_v49  ;;  %v1886_v37 = vunpack.c.l.bf16 %v1885_v41  ;;  %v1895_v6 = vld [vmem:[#allocation40_spill] sm:$0xff] }
  0x76   :  { %v386_v60 = vadd.f32 %v385_v29, %v1880_v58  ;;  %v312_v59 = vadd.f32 %v311_v14, %v1882_v30  ;;  %v1888_v8 = vunpack.c.l.bf16 %v1887_v17  ;;  %v235_v13 = vrot.slane %v234_v42, 4  ;;  %v1897_v29 = vld [vmem:[#allocation33_spill] sm:$0xff] }
  0x77   :  { %v338_v52 = vadd.f32 %v337_v7, %v1884_v26  ;;  %v364_v51 = vadd.f32 %v363_v45, %v1886_v37  ;;  %v261_v1 = vrot.slane %v260_v40, 4  ;;  %v287_v25 = vrot.slane %v286_v32, 4  ;;  %v1899_v7 = vld [vmem:[#allocation41_spill] sm:$0xff] }
  0x78   :  { %v412_v38 = vadd.f32 %v411_v61, %v1888_v8  ;;  %v1890_v20 = vunpack.c.l.bf16 %v1889_v33  ;;  %v313_v24 = vrot.slane %v312_v59, 4  ;;  %v1892_v21 = vunpack.c.l.bf16 %v1891_v53  ;;  %v1901_v61 = vld [vmem:[#allocation34_spill] sm:$0xff]  ;;  %v686_v53 = vld [vmem:[%s1656_s3 + $0x8] sm:$0xff] }
  0x79   :  { %v339_v11 = vrot.slane %v338_v52, 4  ;;  %v365_v48 = vrot.slane %v364_v51, 4  ;;  %v236_v54 = vadd.f32 %v235_v13, %v234_v42  ;;  %v262_v39 = vadd.f32 %v261_v1, %v260_v40  ;;  %v1903_v40 = vld [vmem:[#allocation42_spill] sm:$0xff] }
  0x7a   :  { %v387_v3 = vadd.f32 %v386_v60, %v1890_v20  ;;  %v413_v18 = vadd.f32 %v412_v38, %v1892_v21  ;;  %v288_v12 = vadd.f32 %v287_v25, %v286_v32  ;;  %v1894_v2 = vunpack.c.l.bf16 %v1893_v22 }
  0x7b   :  { %v314_v0 = vadd.f32 %v313_v24, %v312_v59  ;;  %v340_v10 = vadd.f32 %v339_v11, %v338_v52  ;;  %v366_v9 = vadd.f32 %v365_v48, %v364_v51  ;;  %v1896_v46 = vunpack.c.l.bf16 %v1895_v6  ;;  %v685_v48 = vld [vmem:[%s1656_s3] sm:$0xff] }
  0x7c   :  { %v388_v4 = vadd.f32 %v387_v3, %v1894_v2  ;;  %v237_v43 = vrot.slane %v236_v54, 2  ;;  %v263_v50 = vrot.slane %v262_v39, 2  ;;  %v289_v62 = vrot.slane %v288_v12, 2 }
  0x7d   :  { %v414_v56 = vadd.f32 %v413_v18, %v1896_v46  ;;  %v1898_v34 = vunpack.c.l.bf16 %v1897_v29  ;;  %v315_v14 = vrot.slane %v314_v0, 2  ;;  %v341_v63 = vrot.slane %v340_v10, 2 }
  0x7e   :  { %v367_v31 = vrot.slane %v366_v9, 2  ;;  %v1900_v57 = vunpack.c.l.bf16 %v1899_v7  ;;  %v238_v45 = vadd.f32 %v237_v43, %v236_v54  ;;  %v264_v23 = vadd.f32 %v263_v50, %v262_v39 }
  0x7f   :  { %v389_v36 = vadd.f32 %v388_v4, %v1898_v34  ;;  %v290_v35 = vadd.f32 %v289_v62, %v288_v12  ;;  %v1902_v44 = vunpack.c.l.bf16 %v1901_v61  ;;  %v316_v42 = vadd.f32 %v315_v14, %v314_v0  ;;  %v687_v4 = vld [vmem:[%s1656_s3 + $0x10] sm:$0xff]  ;;  %v688_v0 = vld [vmem:[%s1656_s3 + $0x18] sm:$0xff] }
  0x80   :  { %v415_v15 = vadd.f32 %v414_v56, %v1900_v57  ;;  %v342_v55 = vadd.f32 %v341_v63, %v340_v10  ;;  %v368_v5 = vadd.f32 %v367_v31, %v366_v9  ;;  %v1904_v16 = vunpack.c.l.bf16 %v1903_v40  ;;  %v689_v63 = vld [vmem:[%s1656_s3 + $0x20] sm:$0xff]  ;;  %v690_v31 = vld [vmem:[%s1656_s3 + $0x28] sm:$0xff]  ;;  %v691_v61 = vld [vmem:[%s1656_s3 + $0x30] sm:$0xff] }
  0x81   :  { %v390_v28 = vadd.f32 %v389_v36, %v1902_v44  ;;  %v239_v32 = vrot.slane %v238_v45, 1  ;;  %v265_v47 = vrot.slane %v264_v23, 1  ;;  %v291_v58 = vrot.slane %v290_v35, 1  ;;  %v692_v44 = vld [vmem:[%s1656_s3 + $0x38] sm:$0xff]  ;;  %v693_v40 = vld [vmem:[%s1656_s3 + $0x40] sm:$0xff] }
  0x82   :  { %v416_v27 = vadd.f32 %v415_v15, %v1904_v16  ;;  %v317_v19 = vrot.slane %v316_v42, 1  ;;  %v343_v30 = vrot.slane %v342_v55, 1  ;;  %v369_v59 = vrot.slane %v368_v5, 1  ;;  %v694_v16 = vld [vmem:[%s1656_s3 + $0x48] sm:$0xff] }
  0x83   :  { %v391_v60 = vrot.slane %v390_v28, 4  ;;  %v240_v26 = vadd.f32 %v239_v32, %v238_v45  ;;  %v266_v52 = vadd.f32 %v265_v47, %v264_v23  ;;  %v292_v41 = vadd.f32 %v291_v58, %v290_v35  ;;  %v695_v32 = vld [vmem:[%s1656_s3 + $0x50] sm:$0xff]  ;;  %v696_v47 = vld [vmem:[%s1656_s3 + $0x58] sm:$0xff] }
  0x84   :  { %v417_v49 = vrot.slane %v416_v27, 4  ;;  %v318_v51 = vadd.f32 %v317_v19, %v316_v42  ;;  %v344_v17 = vadd.f32 %v343_v30, %v342_v55  ;;  %v370_v8 = vadd.f32 %v369_v59, %v368_v5  ;;  %v698_v19 = vld [vmem:[%s1656_s3 + $0x68] sm:$0xff]  ;;  %v699_v59 = vld [vmem:[%s1656_s3 + $0x70] sm:$0xff] }
  0x85   :  { %v392_v37 = vadd.f32 %v391_v60, %v390_v28  ;;  %v436_v1 = vpack.c.bf16 %v240_v26, %v240_v26  ;;  %v438_v25 = vpack.c.bf16 %v266_v52, %v266_v52  ;;  %v440_v33 = vpack.c.bf16 %v292_v41, %v292_v41  ;;  %v697_v60 = vld [vmem:[%s1656_s3 + $0x60] sm:$0xff] }
  0x86   :  { %v418_v38 = vadd.f32 %v417_v49, %v416_v27  ;;  %v442_v3 = vpack.c.bf16 %v318_v51, %v318_v51  ;;  %v444_v24 = vpack.c.bf16 %v344_v17, %v344_v17  ;;  %v446_v11 = vpack.c.bf16 %v370_v8, %v370_v8  ;;  %v700_v49 = vld [vmem:[%s1656_s3 + $0x78] sm:$0xff]  ;;  %s988_s3 = smov [#allocation5]  }
  0x87   :  { %v393_v13 = vrot.slane %v392_v37, 2  ;;  %v507_v18 = vunpack.c.l.b16 %v436_v1  ;;  %v509_v54 = vunpack.c.l.b16 %v438_v25  ;;  %v511_v39 = vunpack.c.l.b16 %v440_v33  ;;  %v812_v25 = vld [vmem:[%s1657_s4] ss:$0 sm:$0xff]  ;;  %s786_s20 = sshll.u32 %s988_s3, 4  ;;  %s787_s20 = int_to_ptr.vmem [resolvable:$true] %s786_s20 }
  0x88   :  { %v419_v20 = vrot.slane %v418_v38, 2  ;;  %v513_v22 = vunpack.c.l.b16 %v442_v3  ;;  %v515_v2 = vunpack.c.l.b16 %v444_v24  ;;  %v888_v6 = vpack.c.bf16 %v686_v53, %v685_v48  ;;  %p961_p9 = scmp.lt.s32.totalorder %s787_s20, %s787_s20 }
  0x89   :  { %v394_v21 = vadd.f32 %v393_v13, %v392_v37  ;;  %v524_v9 = vsel %vm523_vm0, %v509_v54, %v507_v18  ;;  %v517_v56 = vunpack.c.l.b16 %v446_v11  ;;  %v891_v29 = vpack.c.bf16 %v688_v0, %v687_v4  ;;  %v795_v37 = vld [vmem:[%s1655_s2] ss:$0 sm:$0xff]  ;;  %s956_s2 = scalar_lea.vmem %s787_s20, 128 }
  0x8a   :  { %v420_v12 = vadd.f32 %v419_v20, %v418_v38  ;;  %v526_v43 = vsel %vm525_vm1, %v511_v39, %v524_v9  ;;  %889 = vmatpush3.bf16.msra.mxu1 %v888_v6  ;;  %v1905_v14 = vmov 0.0|0.0   ;;  %v894_v23 = vpack.c.bf16 %v690_v31, %v689_v63  ;;  %p957_p8 = scmp.ne.s32.totalorder %s787_s20, %s956_s2  ;;  %p962_p10 = scmp.lt.s32.totalorder %s956_s2, %s956_s2 }
  0x8b   :  { %v395_v10 = vrot.slane %v394_v21, 1  ;;  %v528_v62 = vsel %vm527_vm2, %v513_v22, %v526_v43  ;;  %890 = vmatprep.subr.bf16.mxu1 %v1905_v14  ;;  %v897_v5 = vpack.c.bf16 %v692_v44, %v691_v61  ;;  %v900_v27 = vpack.c.bf16 %v694_v16, %v693_v40 }
  0x8c   :  { %v421_v46 = vrot.slane %v420_v12, 1  ;;  %v530_v36 = vsel %vm529_vm3, %v515_v2, %v528_v62  ;;  %v903_v58 = vpack.c.bf16 %v696_v47, %v695_v32  ;;  %v906_v30 = vpack.c.bf16 %v698_v19, %v697_v60  ;;  %p963_p11 = por %p962_p10, %p961_p9 }
  0x8d   :  { %v396_v50 = vadd.f32 %v395_v10, %v394_v21  ;;  %v532_v15 = vsel %vm531_vm4, %v517_v56, %v530_v36  ;;  %v909_v26 = vpack.c.bf16 %v700_v49, %v699_v59  ;;  %v987_v52 = vmov 0.0  }
  0x8e   :  { %v422_v34 = vadd.f32 %v421_v46, %v420_v12  ;;  %892 = vmatpush3.bf16.msra.mxu1 %v891_v29  ;;  %884 = vmatprep.mubr.msk.f32.mxu1 %vm986_vm7, %v987_v52  ;;  %p964_p12 = pnand %p963_p11, %p957_p8 }
  0x8f   :  { %v448_v7 = vpack.c.bf16 %v396_v50, %v396_v50  ;;  %893 = vmatprep.subr.bf16.mxu1 %v1905_v14 }
  0x90   :  { %v450_v57 = vpack.c.bf16 %v422_v34, %v422_v34 }
  0x91   :  { %v519_v45 = vunpack.c.l.b16 %v448_v7 }
  0x92   :  { %v521_v35 = vunpack.c.l.b16 %v450_v57  ;;  %895 = vmatpush3.bf16.msra.mxu1 %v894_v23 }
  0x93   :  { %v534_v28 = vsel %vm533_vm5, %v519_v45, %v532_v15  ;;  %896 = vmatprep.subr.bf16.mxu1 %v1905_v14 }
  0x94   :  { %v536_v42 = vsel %vm535_vm6, %v521_v35, %v534_v28 }
  0x95   :  { %v544_v55 = vpack.c.b16 %v536_v42, %v536_v42 }
  0x96   :  { %898 = vmatpush3.bf16.msra.mxu1 %v897_v5 }
  0x97   :  { %677 = vmatmul.mubr.bf16.vlgmr.msra.gmra.mrb[0].mxu0 %v544_v55  ;;  %899 = vmatprep.subr.bf16.mxu1 %v1905_v14 }
  0x9a   :  { %901 = vmatpush3.bf16.msra.mxu1 %v900_v27 }
  0x9b   :  { %902 = vmatprep.subr.bf16.mxu1 %v1905_v14 }
  0x9e   :  { %904 = vmatpush3.bf16.msra.mxu1 %v903_v58 }
  0x9f   :  { %905 = vmatprep.subr.bf16.mxu1 %v1905_v14 }
  0xa2   :  { %907 = vmatpush3.bf16.msra.mxu1 %v906_v30 }
  0xa3   :  { %908 = vmatprep.subr.bf16.mxu1 %v1905_v14 }
  0xa6   :  { %910 = vmatpush3.bf16.msra.mxu1 %v909_v26 }
 0x16a   :  { %v829_v41 = vpop.f32.mrb[0].mxu0 }
 0x16b   :  { %v830_v51 = vpop.f32.mrb[1].mxu0 }
 0x16c   :  { %v831_v17 = vadd.f32 %v830_v51, %v829_v41  ;;  %v832_v8 = vpop.f32.mrb[2].mxu0 }
 0x16d   :  { %v833_v38 = vpop.f32.mrb[3].mxu0 }
 0x16e   :  { %v679_v13 = vadd.f32 %v831_v17, %v795_v37 }
 0x170   :  { %v684_v1 = vmax.f32 %v679_v13, 0.0 }
 0x172   :  { %885 = vmatmul.mubr.f32.vlgmr.msra.gmra.mrb[0].mxu1 %v684_v1 }
 0x245   :  { %v774_v33 = vpop.f32.mrb[0].mxu1 }
 0x246   :  { %v775_v20 = vadd.f32 %v812_v25, %v774_v33  ;;  %v886_v3 = vpop.f32.mrb[1].mxu1 }
 0x248   :  { %779 = vst.msk [vmem:[#allocation5] sm:$0xff] %vm778_vm8, %v775_v20 }
 0x249   :  { %967 = shalt.err (!%p964_p12)
}
 0x24a   :  { %s968_s23 = scalar_lea.hbm %s1658_s5, 128 }
 0x24b   :  { %p969_p13 = scmp.ne.s32.totalorder %s1658_s5, %s968_s23  ;;  %p972_p0 = scmp.lt.u32.totalorder %s968_s23, %s1658_s5 }
 0x24d   :  { %p974_p1 = pnand %p972_p0, %p969_p13 }
 0x24f   :  { %977 = shalt.err (!%p974_p1)
}
 0x250   :  { %789 = dma.vmem_to_hbm [thread:$0]  %s787_s20, 128, %s1658_s5, [#allocation4]  }
 0x251   :  { %980 = dma.done.wait [#allocation4], 128  }
 0x252   :  { %981 = vsyncadd [#allocation4], 4294967168 }
 0x253   :  { %793 = vsyncpa [#allocation3], 1 }
 0x254   :  { %794 = vsyncpa [#allocation4], 1 }

</bundles_post_ra>
